<compile_context>
chip_gen: v7x
topology: tpu7x:2x2x1
jax: 0.10.0
libtpu: 0.0.40
codegen_flags: <defaults>
</compile_context>

<pallas_src>
import jax
import jax.numpy as jnp
from jax.experimental import pallas as pl
from jax.experimental.pallas import tpu as pltpu


def _round_up(x: int, m: int) -> int:
    return ((x + m - 1) // m) * m


def _round_down(x: int, m: int) -> int:
    return (x // m) * m


def swish_kernel(x_ref, alpha_ref, beta_ref, o_ref):
    # Upcast the tile to f32: the kernel is HBM-bound, so f32 math is free and
    # avoids double-rounding beta*x / sigmoid for sub-32-bit inputs.
    x = x_ref[...].astype(jnp.float32)        # (tn, tf)
    alpha = alpha_ref[...]                    # (1, tf) f32, broadcasts over rows
    beta = beta_ref[...]                      # (1, tf) f32
    z = beta * x
    sig = 1.0 / (1.0 + jnp.exp(-z))           # exact sigmoid (matches torch.sigmoid)
    o_ref[...] = (alpha * x * sig).astype(o_ref.dtype)


def swish(x, alpha, beta, *, block_bytes: int = 2 * 1024 * 1024):
    """Feature-wise Swish: alpha * x * sigmoid(beta * x).

    x: [..., F]; alpha, beta: [F]. Returns an array with the same shape as x.
    """
    orig_shape = x.shape
    F = orig_shape[-1]
    dtype = x.dtype
    itemsize = jnp.dtype(dtype).itemsize
    sublane = max(1, (8 * 4) // itemsize)     # 8 for f32, 16 for bf16, 32 for int8/fp8

    x2 = x.reshape(-1, F)
    N0 = x2.shape[0]

    # ---- lane-densify small feature dims --------------------------------------
    # If F divides 128, fold 128//F rows into one lane-dense row of width 128 so
    # output stores are full-lane (unmasked vst). alpha/beta are tiled to match.
    alpha_eff, beta_eff = alpha, beta
    fold = 1
    if F < 128 and 128 % F == 0 and N0 % (128 // F) == 0:
        fold = 128 // F
        x2 = x2.reshape(N0 // fold, F * fold)
        alpha_eff = jnp.tile(alpha, (fold,))
        beta_eff = jnp.tile(beta, (fold,))
    # TODO(synk): F that is small but does NOT divide 128 still produces masked
    # partial lane stores; a fully flattened lane-dense slab would fix that too.

    N, Fe = x2.shape

    # ---- feature tiling: lane-dense (multiple-of-128) tiles only when Fe is big
    max_tf = 2048
    if Fe % 128 == 0 and Fe > max_tf:
        tf = max_tf
        while Fe % tf != 0:
            tf -= 128
    else:
        tf = Fe                                # whole feature dim as one block

    # ---- row tiling: byte-budgeted (~2 MiB blocks sit near the HBM roofline),
    # rounded to the dtype's sublane tile. No pad/slice: cdiv grid + masked tail.
    tn = max(sublane, _round_down(block_bytes // (tf * itemsize), sublane))
    tn = min(tn, _round_up(N, sublane))

    f_blocks = Fe // tf
    n_blocks = pl.cdiv(N, tn)
    # Guarantee >=2 blocks so both v7x TensorCores get work and the HBM<->VMEM
    # DMA can double-buffer (a single grid step exposes the whole DMA).
    while n_blocks * f_blocks < 2 and tn > sublane:
        tn = max(sublane, _round_up(tn // 2, sublane))
        n_blocks = pl.cdiv(N, tn)

    # Learnable params stay f32 inside the kernel (no double rounding).
    alpha2 = alpha_eff.reshape(1, Fe).astype(jnp.float32)
    beta2 = beta_eff.reshape(1, Fe).astype(jnp.float32)

    # Feature axis outermost: the tiny (1, tf) alpha/beta DMAs change only when
    # the feature block changes, not on every row step.
    grid = (f_blocks, n_blocks)

    out = pl.pallas_call(
        swish_kernel,
        out_shape=jax.ShapeDtypeStruct((N, Fe), dtype),
        grid_spec=pltpu.PrefetchScalarGridSpec(
            num_scalar_prefetch=0,
            grid=grid,
            in_specs=[
                pl.BlockSpec((tn, tf), lambda j, i: (i, j)),   # x tile
                pl.BlockSpec((1, tf), lambda j, i: (0, j)),    # alpha (VMEM-resident)
                pl.BlockSpec((1, tf), lambda j, i: (0, j)),    # beta  (VMEM-resident)
            ],
            out_specs=pl.BlockSpec((tn, tf), lambda j, i: (i, j)),
        ),
        # ~2 MiB blocks, double-buffered in+out (~8 MiB) + resident params fit
        # every generation's default scoped VMEM: no vmem_limit override needed.
        compiler_params=pltpu.CompilerParams(
            dimension_semantics=("parallel", "parallel")),
    )(x2, alpha2, beta2)

    return out.reshape(orig_shape)


if __name__ == "__main__":
    key = jax.random.PRNGKey(0)
    initial_alpha = 1.0
    initial_beta = 1.702

    def run_case(batch, num_features, dtype=jnp.float32):
        k = jax.random.fold_in(key, batch * 1000 + num_features)
        x = jax.random.normal(k, (batch, num_features), dtype=dtype)
        # Deterministic parameter init, matching nn.init.constant_ in the module.
        alpha = jnp.full((num_features,), initial_alpha, dtype=jnp.float32)
        beta = jnp.full((num_features,), initial_beta, dtype=jnp.float32)

        y = jax.block_until_ready(swish(x, alpha, beta))

        xf = x.astype(jnp.float32)
        y_ref = (alpha * xf * jax.nn.sigmoid(beta * xf)).astype(dtype)
        assert y.shape == x.shape
        assert jnp.allclose(y, y_ref, atol=1e-5, rtol=1e-5), (
            f"mismatch vs reference for shape {(batch, num_features)}")

    run_case(64, 128)     # lane-dense F, multiple row blocks
    run_case(30, 64)      # small F -> lane-fold path + masked tail rows
    run_case(37, 128)     # N not a multiple of the sublane tile (cdiv grid)

    print("KERNEL_OK")
</pallas_src>

<mosaic_0001>
module attributes {stable_mosaic.version = 11 : i64} {
  func.func @swish_kernel(%arg0: i32, %arg1: i32, %arg2: memref<32x128xf32, #tpu.memory_space<vmem>>, %arg3: memref<1x128xf32, #tpu.memory_space<vmem>>, %arg4: memref<1x128xf32, #tpu.memory_space<vmem>>, %arg5: memref<32x128xf32, #tpu.memory_space<vmem>>) attributes {dimension_semantics = [#tpu.dimension_semantics<parallel>, #tpu.dimension_semantics<parallel>], iteration_bounds = array<i64: 1, 2>, scalar_prefetch = 0 : i64, scratch_operands = 0 : i64, tpu.core_type = #tpu.core_type<tc>, window_params = [{transform_indices = @transform_0, window_bounds = array<i64: 32, 128>}, {transform_indices = @transform_1, window_bounds = array<i64: 1, 128>}, {transform_indices = @transform_2, window_bounds = array<i64: 1, 128>}, {transform_indices = @transform_3, window_bounds = array<i64: 32, 128>}]} {
    %c0 = arith.constant 0 : index
    %c0_0 = arith.constant 0 : index
    %0 = vector.load %arg2[%c0, %c0_0] : memref<32x128xf32, #tpu.memory_space<vmem>>, vector<32x128xf32>
    %c0_1 = arith.constant 0 : index
    %c0_2 = arith.constant 0 : index
    %1 = vector.load %arg3[%c0_1, %c0_2] : memref<1x128xf32, #tpu.memory_space<vmem>>, vector<1x128xf32>
    %c0_3 = arith.constant 0 : index
    %c0_4 = arith.constant 0 : index
    %2 = vector.load %arg4[%c0_3, %c0_4] : memref<1x128xf32, #tpu.memory_space<vmem>>, vector<1x128xf32>
    %3 = vector.broadcast %2 : vector<1x128xf32> to vector<32x128xf32>
    %4 = arith.mulf %3, %0 : vector<32x128xf32>
    %cst = arith.constant 0.000000e+00 : f32
    %5 = vector.broadcast %cst : f32 to vector<32x128xf32>
    %6 = arith.subf %5, %4 : vector<32x128xf32>
    %7 = math.exp %6 : vector<32x128xf32>
    %cst_5 = arith.constant 1.000000e+00 : f32
    %8 = vector.broadcast %cst_5 : f32 to vector<32x128xf32>
    %9 = arith.addf %8, %7 : vector<32x128xf32>
    %cst_6 = arith.constant 1.000000e+00 : f32
    %10 = vector.broadcast %cst_6 : f32 to vector<32x128xf32>
    %11 = arith.divf %10, %9 : vector<32x128xf32>
    %12 = vector.broadcast %1 : vector<1x128xf32> to vector<32x128xf32>
    %13 = arith.mulf %12, %0 : vector<32x128xf32>
    %14 = arith.mulf %13, %11 : vector<32x128xf32>
    %c0_7 = arith.constant 0 : index
    %c0_8 = arith.constant 0 : index
    %15 = vector.load %arg5[%c0_7, %c0_8] : memref<32x128xf32, #tpu.memory_space<vmem>>, vector<32x128xf32>
    tpu.vector_store %arg5[%c0_7, %c0_8], %14 {strides = array<i32>} : memref<32x128xf32, #tpu.memory_space<vmem>>, vector<32x128xf32>,
    return
  }
  func.func @transform_0(%arg0: i32, %arg1: i32) -> (i32, i32) {
    %c0_i32 = arith.constant 0 : i32
    return %arg1, %arg0 : i32, i32
  }
  func.func @transform_1(%arg0: i32, %arg1: i32) -> (i32, i32) {
    %c0_i32 = arith.constant 0 : i32
    %c0_i32_0 = arith.constant 0 : i32
    return %c0_i32, %arg0 : i32, i32
  }
  func.func @transform_2(%arg0: i32, %arg1: i32) -> (i32, i32) {
    %c0_i32 = arith.constant 0 : i32
    %c0_i32_0 = arith.constant 0 : i32
    return %c0_i32, %arg0 : i32, i32
  }
  func.func @transform_3(%arg0: i32, %arg1: i32) -> (i32, i32) {
    %c0_i32 = arith.constant 0 : i32
    return %arg1, %arg0 : i32, i32
  }
}

</mosaic_0001>

<bundles_post_ra>
// kernel: tpu_custom_call.1
= control target key start
LH: loop header
LB: loop body
LE: loop exit
PB: predicated region body
PF: predicated region fallthrough
CT: control target
= control target key end

     0   :  { %8 = vsyncpa [#allocation3], 0  ;;  %s846_s0 = inlined_call_operand.hbm [shape: f32[64,128], index: 0, kind: input, shape index: {}]   ;;  %s847_s1 = inlined_call_operand.vmem [shape: f32[1,128], index: 1, kind: input, shape index: {}]   ;;  %s848_s2 = inlined_call_operand.vmem [shape: f32[1,128], index: 2, kind: input, shape index: {}]   ;;  %s849_s3 = inlined_call_operand.hbm [shape: f32[64,128], index: 3, kind: output, shape index: {}]  }
   0x1   :  { %10 = vsyncpa [#allocation3 + $0x1], 0 }
   0x2   :  { %11 = vsyncpa [#allocation4], 0 }
   0x3   :  { %13 = vsyncpa [#allocation4 + $0x1], 0  ;;  %s661_s12 = smov 0   ;;  %s663_s13 = smov 0  }
   0x4   :  { %s665_s14 = smov 0   ;;  %s667_s15 = smov 0  }
   0x5   :  { %s669_s16 = smov 0   ;;  %s671_s17 = smov 0  }
   0x6 LB: > { %s418_s18 = sadd.s32 4294967295, %s633_s17   ;;  %s419_s19 = sadd.s32 4294967294, %s633_s17   ;;  %s633_s17 = sphi %s671_s17, %s19_s17   ;;  %s629_s16 = sphi %s669_s16, %s864_s16   ;;  %s625_s15 = sphi %s667_s15, %s863_s15   ;;  %s621_s14 = sphi %s665_s14, %s862_s14   ;;  %s617_s13 = sphi %s663_s13, %s861_s13   ;;  %s613_s12 = sphi %s661_s12, %s860_s12  }
   0x7   : > { %s28_s20 = sadd.s32 1, %s629_s16  ;;  %s40_s21 = sadd.s32 1, %s621_s14 }
   0x8   : > { %p29_p0 = scmp.ge.s32.totalorder %s28_s20, 2  ;;  %p47_p1 = scmp.ne.s32.totalorder %s621_s14, %s617_s13 }
   0x9   : > { %p48_p2 = scmp.eq.s32.totalorder %s633_s17, 0  ;;  %p53_p3 = scmp.ne.s32.totalorder %s617_s13, %s613_s12 }
   0xa   : > { %s866_s20 = smov (%p29_p0, %s28_s20), 0  ;;  %p54_p5 = scmp.eq.s32.totalorder %s418_s18, 0 }
   0xb   : > { %p702_p4 = por %p48_p2, %p47_p1  ;;  %s35_s23 = ssub.s32 %s629_s16, %s866_s20 }
   0xc   : > { %p131_p6 = scmp.eq.s32.totalorder %s418_s18, 1  ;;  %p38_p7 = scmp.eq.s32.totalorder %s35_s23, 0 }
   0xd   : > { %p708_p8 = por %p54_p5, %p53_p3  ;;  %p137_p10 = scmp.eq.s32.totalorder %s419_s19, 1 }
   0xe   : > { %p712_p9 = por %p131_p6, %p47_p1  ;;  %p451_p13 = scmp.lt.s32.totalorder %s633_s17, 2 }
   0xf   : > { %s717_s26 = scalar_select %p38_p7, %s621_s14, %s40_s21  }
  0x10   : > { %s853_s25 = scalar_select %p712_p9, 1, 0 }
  0x11   : > { %p719_p11 = por %p137_p10, %p53_p3  ;;  %s169_s28 = sand.u32 1, %s621_s14  }
  0x12   : > { %s424_s29 = sshll.u32 %s169_s28, 5  ;;  %s437_s30 = sshll.u32 %s629_s16, 9 }
  0x13   : > { %s854_s27 = scalar_select %p719_p11, 1, 0 }
  0x14   : > { %s730_s6 = scalar_lea.hbm %s846_s0, %s437_s30  ;;  %s173_s7 = scalar_lea.vmem [#allocation2], %s424_s29 }
  0x15   : > { %s181_s8 = sshll.u32 %s173_s7, 4  ;;  %p736_p0 = pnand %p451_p13, %p702_p4  ;;  %s732_s8 = int_to_ptr.vmem [resolvable:$true] %s181_s8 }
  0x16   : > { %s741_s10 = scalar_lea.sflag [#allocation3], %s169_s28  ;;  %s521_s11 = scalar_lea.hbm %s730_s6, 512 }
  0x17   : > { %p522_p2 = scmp.ne.s32.totalorder %s730_s6, %s521_s11  ;;  %p523_p3 = pneg %p736_p0 }
  0x18   : > { %s526_s21 = scalar_lea.hbm %s846_s0, 1024  ;;  %p527_p4 = scmp.lt.u32.totalorder %s730_s6, %s846_s0 }
  0x19   : > { %p524_p5 = pnand %p523_p3, %p522_p2  ;;  %p528_p7 = scmp.lt.u32.totalorder %s526_s21, %s521_s11 }
  0x1a   : > { %p530_p13 = scmp.lt.u32.totalorder %s521_s11, %s730_s6 }
  0x1b   : > { %p525_p6 = pneg %p524_p5  ;;  %p529_p10 = por %p528_p7, %p527_p4 }
  0x1d   : > { %p531_p12 = por %p530_p13, %p529_p10 }
  0x1f   : > { %p532_p1 = pnand %p531_p12, %p525_p6 }
  0x21   : > { %535 = shalt.err (!%p532_p1)
}
  0x22   : > { %s536_s28 = scalar_lea.vmem %s732_s8, 512  ;;  %s635_s29 = smov [#allocation2]  }
  0x23   : > { %p537_p2 = scmp.ne.s32.totalorder %s732_s8, %s536_s28  ;;  %s541_s30 = sshll.u32 %s635_s29, 4  ;;  %s542_s30 = int_to_ptr.vmem [resolvable:$false] %s541_s30 }
  0x24   : > { %s543_s4 = scalar_lea.vmem %s542_s30, 1024  ;;  %p544_p9 = scmp.lt.s32.totalorder %s732_s8, %s542_s30 }
  0x25   : > { %p539_p5 = pnand %p537_p2, %p523_p3  ;;  %p545_p4 = scmp.lt.s32.totalorder %s543_s4, %s536_s28 }
  0x27   : > { %p540_p11 = pneg %p539_p5  ;;  %p546_p7 = por %p545_p4, %p544_p9 }
  0x29   : > { %p547_p10 = pnand %p546_p7, %p540_p11 }
  0x2b   : > { %550 = shalt.err (!%p547_p10)
}
  0x2c   : > { %s636_s5 = smov 128   ;;  %s637_s7 = smov 8  }
  0x2d   : > { %446 = dma.hbm_to_vmem [thread:$0]  (!%p736_p0), %s730_s6, 512, %s732_s8, %s741_s10, %s636_s5, %s636_s5, %s637_s7  }
  0x2e   : > { %p189_p12 = scmp.lt.s32.totalorder %s633_s17, 3  ;;  %p856_p1 = scmp.ge.s32.totalorder %s633_s17, 1 }
  0x30   : > { %p190_p3 = pnand %p856_p1, %p189_p12 }
  0x31   : > { %s773_s11 = sand.u32 (!%p190_p3), 1, %s617_s13  }
  0x32   : > { %193 = sbr.rel (%p190_p3) target bundleno = 110 (0x6e), region = 32  ;;  %s428_s18 = sshll.u32 (!%p190_p3), %s773_s11, 5 }
  0x33   : > { %s196_s19 = scalar_lea.sflag (!%p190_p3), [#allocation3], %s773_s11  ;;  %s199_s21 = scalar_lea.vmem (!%p190_p3), [#allocation2], %s428_s18 }
  0x39   : > { %604 = dma.done.wait (%p708_p8), %s196_s19, 512  }
  0x3a   : > { %606 = vsyncadd (%p708_p8), %s196_s19, 4294966784  ;;  %v236_v0 = vld [vmem:[%s199_s21] sm:$0xff]  ;;  %v237_v3 = vld [vmem:[%s199_s21 + $0x8] sm:$0xff]  ;;  %s227_s10 = scalar_lea.vmem [#allocation5], %s428_s18  ;;  %s438_s23 = sshll.u32 %s625_s15, 9 }
  0x3b   : > { %v430_v1 = vld [vmem:[%s848_s2] ss:$0 sm:$0xff]  ;;  %v238_v4 = vld [vmem:[%s199_s21 + $0x10] sm:$0xff]  ;;  %v239_v5 = vld [vmem:[%s199_s21 + $0x18] sm:$0xff]  ;;  %s309_s22 = sshll.u32 %s227_s10, 4  ;;  %s797_s30 = scalar_lea.hbm %s849_s3, %s438_s23  ;;  %s792_s22 = int_to_ptr.vmem [resolvable:$true] %s309_s22 }
  0x3c   : > { %v248_v2 = vmul.f32 %v430_v1, %v236_v0  ;;  %v249_v6 = vmul.f32 %v430_v1, %v237_v3  ;;  %v250_v7 = vmul.f32 %v430_v1, %v238_v4  ;;  %v251_v9 = vmul.f32 %v430_v1, %v239_v5  ;;  %v431_v25 = vld [vmem:[%s847_s1] ss:$0 sm:$0xff]  ;;  %s295_s15 = scalar_lea.sflag [#allocation4], %s773_s11  ;;  %s551_s4 = scalar_lea.vmem %s792_s22, 512 }
  0x3d   : > { %v282_v26 = vmul.f32 %v431_v25, %v236_v0  ;;  %v283_v27 = vmul.f32 %v431_v25, %v237_v3  ;;  %v284_v28 = vmul.f32 %v431_v25, %v238_v4  ;;  %v285_v30 = vmul.f32 %v431_v25, %v239_v5  ;;  %p552_p8 = scmp.ne.s32.totalorder %s792_s22, %s551_s4  ;;  %p857_p9 = scmp.ne.s32.totalorder %s853_s25, 0 }
  0x3e   : > { %v252_v8 = vsub.f32 0.0, %v248_v2  ;;  %v253_v10 = vsub.f32 0.0, %v249_v6  ;;  %v254_v11 = vsub.f32 0.0, %v250_v7  ;;  %v255_v13 = vsub.f32 0.0, %v251_v9  ;;  %s638_s5 = smov [#allocation5]  }
  0x3f   : > { %p553_p11 = pnand %p552_p8, %p857_p9  ;;  %s555_s7 = sshll.u32 %s638_s5, 4  ;;  %s556_s7 = int_to_ptr.vmem [resolvable:$false] %s555_s7 }
  0x40   : > { %v256_v12 = vmul.f32 1.442695, %v252_v8  ;;  %v258_v14 = vmul.f32 1.442695, %v253_v10  ;;  %v260_v15 = vmul.f32 1.442695, %v254_v11  ;;  %p558_p6 = scmp.lt.s32.totalorder %s792_s22, %s556_s7 }
  0x41   : > { %v262_v16 = vmul.f32 1.442695, %v255_v13  ;;  %p554_p0 = pneg %p553_p11  ;;  %s557_s18 = scalar_lea.vmem %s556_s7, 1024 }
  0x42   : > { %505 = vpow2.f32 %v256_v12  ;;  %p559_p13 = scmp.lt.s32.totalorder %s557_s18, %s551_s4 }
  0x43   : > { %507 = vpow2.f32 %v258_v14 }
  0x44   : > { %509 = vpow2.f32 %v260_v15  ;;  %p560_p2 = por %p559_p13, %p558_p6 }
  0x45   : > { %511 = vpow2.f32 %v262_v16 }
  0x46   : > { %p561_p5 = pnand %p560_p2, %p554_p0 }
  0x4c   : > { %v506_v17 = vpop.eup %505 }
  0x4d   : > { %v508_v18 = vpop.eup %507  ;;  %v264_v19 = vadd.f32 1.0, %v506_v17 }
  0x4e   : > { %v510_v20 = vpop.eup %509  ;;  %v265_v21 = vadd.f32 1.0, %v508_v18 }
  0x4f   : > { %v512_v22 = vpop.eup %511  ;;  %513 = vrcp.f32 %v264_v19  ;;  %v266_v23 = vadd.f32 1.0, %v510_v20 }
  0x50   : > { %515 = vrcp.f32 %v265_v21  ;;  %v267_v24 = vadd.f32 1.0, %v512_v22 }
  0x51   : > { %517 = vrcp.f32 %v266_v23 }
  0x52   : > { %519 = vrcp.f32 %v267_v24 }
  0x59   : > { %v514_v29 = vpop.eup %513 }
  0x5a   : > { %v516_v31 = vpop.eup %515  ;;  %v286_v32 = vmul.f32 %v514_v29, %v282_v26 }
  0x5b   : > { %v518_v33 = vpop.eup %517  ;;  %v287_v34 = vmul.f32 %v516_v31, %v283_v27 }
  0x5c   : > { %v520_v35 = vpop.eup %519  ;;  %290 = vst [vmem:[%s227_s10] sm:$0xff] %v286_v32  ;;  %v288_v36 = vmul.f32 %v518_v33, %v284_v28 }
  0x5d   : > { %291 = vst [vmem:[%s227_s10 + $0x8] sm:$0xff] %v287_v34  ;;  %v289_v37 = vmul.f32 %v520_v35, %v285_v30 }
  0x5e   : > { %292 = vst [vmem:[%s227_s10 + $0x10] sm:$0xff] %v288_v36 }
  0x5f   : > { %293 = vst [vmem:[%s227_s10 + $0x18] sm:$0xff] %v289_v37 }
  0x60   : > { %564 = shalt.err (!%p561_p5)
}
  0x61   : > { %s565_s19 = scalar_lea.hbm %s797_s30, 512  ;;  %s569_s8 = scalar_lea.hbm %s849_s3, 1024 }
  0x62   : > { %p566_p4 = scmp.ne.s32.totalorder %s797_s30, %s565_s19  ;;  %p570_p12 = scmp.lt.u32.totalorder %s797_s30, %s849_s3 }
  0x63   : > { %p571_p1 = scmp.lt.u32.totalorder %s569_s8, %s565_s19  ;;  %p573_p8 = scmp.lt.u32.totalorder %s565_s19, %s797_s30 }
  0x64   : > { %p567_p7 = pnand %p566_p4, %p857_p9 }
  0x65   : > { %p572_p3 = por %p571_p1, %p570_p12 }
  0x66   : > { %p568_p10 = pneg %p567_p7 }
  0x67   : > { %p574_p11 = por %p573_p8, %p572_p3 }
  0x69   : > { %p575_p0 = pnand %p574_p11, %p568_p10 }
  0x6b   : > { %578 = shalt.err (!%p575_p0)
}
  0x6c   : > { %s639_s10 = smov 128   ;;  %s640_s23 = smov 8  }
  0x6d   : > { %441 = dma.vmem_to_hbm [thread:$0]  (%p857_p9), %s792_s22, 512, %s797_s30, %s295_s15, %s639_s10, %s639_s10, %s640_s23  }
  0x6e PF: > { %s324_s28 = sand.u32 1, %s613_s12   ;;  %p858_p6 = scmp.ne.s32.totalorder %s854_s27, 0 }
  0x6f   : > { %p859_p13 = scmp.ge.s32.totalorder %s633_s17, 2  ;;  %s325_s29 = scalar_lea.sflag [#allocation4], %s324_s28 }
  0x71   : > { %p448_p2 = pnand %p859_p13, %p858_p6 }
  0x73   : > { %608 = dma.done.wait (!%p448_p2), %s325_s29, 512  }
  0x74   : > { %610 = vsyncadd (!%p448_p2), %s325_s29, 4294966784  ;;  %s19_s17 = sadd.s32 1, %s633_s17   ;;  %s860_s12 = smov %s617_s13 }
  0x75   : > { %p16_p5 = scmp.ge.s32.totalorder %s19_s17, 4   ;;  %s861_s13 = smov %s621_s14 }
  0x76   : > { %s862_s14 = smov %s717_s26  ;;  %s863_s15 = smov %s629_s16 }
  0x77   : > { %s864_s16 = smov %s866_s20  ;;  %18 = sbr.rel (!%p16_p5) target bundleno = 6 (0x6), region = 83 }
  0x7e   :  { %330 = vsyncpa [#allocation3], 1 }
  0x7f   :  { %332 = vsyncpa [#allocation3 + $0x1], 1 }
  0x80   :  { %333 = vsyncpa [#allocation4], 1 }
  0x81   :  { %335 = vsyncpa [#allocation4 + $0x1], 1 }

</bundles_post_ra>
